<compile_context>
chip_gen: v6e
topology: v6e:2x2x1
jax: 0.10.0
libtpu: 0.0.40
codegen_flags: <defaults>
</compile_context>

<pallas_src>
import jax
import jax.numpy as jnp
from jax.experimental import pallas as pl
from jax.experimental.pallas import tpu as pltpu

# ----------------------------- configuration --------------------------------
NUM_SUBGOALS = 2
EMB_SIZE = 4
REL_HIDDENS = (16, 16)
MLP_HIDDENS = (16,)
OBJECT_SIZE = 3
NUM_OBJECTS = NUM_SUBGOALS + 3            # own + agent + 2 subgoals + goal = 5
LEAKY_SLOPE = 0.01                        # torch.nn.functional.leaky_relu default
TILE_B_DEFAULT = 1024                     # batch tile (fits VMEM on v5e/v6e/v7x)


def _leaky_relu(x):
    return jnp.where(x >= 0, x, LEAKY_SLOPE * x)


def _round_up(x, m):
    return ((x + m - 1) // m) * m


# ------------------------------- Pallas kernel -------------------------------
def relation_kernel(x_ref,                # (tile_b, 15)
                    w1_ref, b1_ref,       # (15, 80), (1, 80)
                    w2_ref, b2_ref,       # (80, 80), (1, 80)
                    w3_ref, b3_ref,       # (80, 16), (1, 16)
                    out_ref):             # (tile_b, 16)
    x = x_ref[...]
    # Layer 1 for all 5 objects at once (embedding terms folded into b1_big).
    h = jnp.dot(x, w1_ref[...], preferred_element_type=jnp.float32) + b1_ref[...]
    h = _leaky_relu(h)
    # Layer 2: block-diagonal => independent per-object 16->16 layers.
    h = jnp.dot(h, w2_ref[...], preferred_element_type=jnp.float32) + b2_ref[...]
    h = _leaky_relu(h)
    # Final MLP: vstack'ed W3 folds the sum over objects into the matmul.
    o = jnp.dot(h, w3_ref[...], preferred_element_type=jnp.float32) + b3_ref[...]
    o = _leaky_relu(o)
    out_ref[...] = o.astype(out_ref.dtype)


# --------------------------- parameter packing (glue) -------------------------
def _pack_params(params):
    """Fold embeddings into per-object biases and pack the 5 object MLPs."""
    O, H, E, S = NUM_OBJECTS, REL_HIDDENS[0], EMB_SIZE, OBJECT_SIZE
    W1, b1 = params["rel_w1"], params["rel_b1"]     # (14,16), (1,16)
    W2, b2 = params["rel_w2"], params["rel_b2"]     # (16,16), (1,16)
    W3, b3 = params["mlp_w1"], params["mlp_b1"]     # (16,16), (1,16)

    w1_own_x = W1[0:S]                 # rows for own x-features      (3,16)
    w1_own_e = W1[S:S + E]             # rows for own embedding       (4,16)
    w1_obj_x = W1[S + E:2 * S + E]     # rows for other x-features    (3,16)
    w1_obj_e = W1[2 * S + E:]          # rows for other embedding     (4,16)

    emb = jnp.stack(
        [params["own_emb"], params["agent_emb"]]
        + [params["subgoal_emb"]] * (O - 3)
        + [params["goal_emb"]],
        axis=0,
    )                                                   # (O, E)

    # W1_big: (O*3, O*H). Own x-features feed every object block; object j's
    # x-features feed only block j (for j=0 both land on rows 0:3 and add).
    w1_big = jnp.concatenate(
        [jnp.tile(w1_own_x, (1, O)),
         jnp.zeros((O * S - S, O * H), jnp.float32)], axis=0)
    for j in range(O):
        w1_big = w1_big.at[j * S:(j + 1) * S, j * H:(j + 1) * H].add(w1_obj_x)

    # b1_big: constant embedding contributions + original bias, per object.
    own_term = params["own_emb"] @ w1_own_e             # (H,)
    b1_big = jnp.concatenate(
        [own_term + emb[j] @ w1_obj_e + b1[0] for j in range(O)])[None, :]

    # W2_big: block-diagonal second relation layer.
    w2_big = jnp.zeros((O * H, O * H), jnp.float32)
    for j in range(O):
        w2_big = w2_big.at[j * H:(j + 1) * H, j * H:(j + 1) * H].set(W2)
    b2_big = jnp.tile(b2, (1, O))                       # (1, O*H)

    # W3_big: vstack folds sum_j h2_j @ W3 into one matmul.
    w3_big = jnp.concatenate([W3] * O, axis=0)          # (O*H, out)
    return w1_big, b1_big, w2_big, b2_big, w3_big, b3


# ------------------------------ wrapper (glue) --------------------------------
def relation_layer_forward(x, params, *, tile_b=TILE_B_DEFAULT):
    """x: (B, NUM_OBJECTS*3) float32 -> (B, MLP_HIDDENS[-1]) float32."""
    B = x.shape[0]
    assert x.shape[-1] == NUM_OBJECTS * OBJECT_SIZE

    w1_big, b1_big, w2_big, b2_big, w3_big, b3 = _pack_params(params)

    d_in = NUM_OBJECTS * OBJECT_SIZE          # 15
    d_h = NUM_OBJECTS * REL_HIDDENS[-1]       # 80
    d_out = MLP_HIDDENS[-1]                   # 16

    # Batch tile: multiple of 8 sublanes, capped so VMEM is safe on v7x too.
    tb = min(tile_b, _round_up(B, 8))
    grid = (pl.cdiv(B, tb),)

    return pl.pallas_call(
        relation_kernel,
        out_shape=jax.ShapeDtypeStruct((B, d_out), jnp.float32),
        grid=grid,
        in_specs=[
            pl.BlockSpec((tb, d_in), lambda i: (i, 0)),       # x tile
            pl.BlockSpec((d_in, d_h), lambda i: (0, 0)),      # W1_big (resident)
            pl.BlockSpec((1, d_h), lambda i: (0, 0)),         # b1_big
            pl.BlockSpec((d_h, d_h), lambda i: (0, 0)),       # W2_big
            pl.BlockSpec((1, d_h), lambda i: (0, 0)),         # b2_big
            pl.BlockSpec((d_h, d_out), lambda i: (0, 0)),     # W3_big
            pl.BlockSpec((1, d_out), lambda i: (0, 0)),       # b3
        ],
        out_specs=pl.BlockSpec((tb, d_out), lambda i: (i, 0)),
        compiler_params=pltpu.CompilerParams(
            dimension_semantics=("parallel",)),
    )(x.astype(jnp.float32),
      w1_big, b1_big, w2_big, b2_big, w3_big, b3)


# --------------------------- pure-JAX reference ------------------------------
def relation_layer_reference(x, params):
    B = x.shape[0]
    x_obj = x.reshape(B, NUM_OBJECTS, OBJECT_SIZE)
    emb = jnp.stack(
        [params["own_emb"], params["agent_emb"]]
        + [params["subgoal_emb"]] * (NUM_OBJECTS - 3)
        + [params["goal_emb"]],
        axis=0,
    )
    emb_b = jnp.broadcast_to(emb[None, :, :], (B, NUM_OBJECTS, EMB_SIZE))
    inputs = jnp.concatenate([x_obj, emb_b], axis=-1)
    own = inputs[:, 0, :]
    rel_outputs = 0.0
    for j in range(NUM_OBJECTS):
        c = jnp.concatenate([own, inputs[:, j, :]], axis=-1)
        h = _leaky_relu(c @ params["rel_w1"] + params["rel_b1"][0])
        h = _leaky_relu(h @ params["rel_w2"] + params["rel_b2"][0])
        rel_outputs = rel_outputs + h
    o = _leaky_relu(rel_outputs @ params["mlp_w1"] + params["mlp_b1"][0])
    return o


# ------------------------------ parameter init --------------------------------
def init_params(key):
    rel_in = 2 * (EMB_SIZE + OBJECT_SIZE)                        # 14
    ks = jax.random.split(key, 10)
    return {
        "own_emb":     jax.random.normal(ks[0], (EMB_SIZE,), jnp.float32) / 10.0,
        "agent_emb":   jax.random.normal(ks[1], (EMB_SIZE,), jnp.float32) / 10.0,
        "subgoal_emb": jax.random.normal(ks[2], (EMB_SIZE,), jnp.float32) / 10.0,
        "goal_emb":    jax.random.normal(ks[3], (EMB_SIZE,), jnp.float32) / 10.0,
        # relation layers: 14 -> 16 -> 16
        "rel_w1": jax.random.normal(ks[4], (rel_in, REL_HIDDENS[0]), jnp.float32) * 0.1,
        "rel_b1": jax.random.normal(ks[5], (1, REL_HIDDENS[0]), jnp.float32) * 0.1,
        "rel_w2": jax.random.normal(ks[6], (REL_HIDDENS[0], REL_HIDDENS[1]), jnp.float32) * 0.1,
        "rel_b2": jax.random.normal(ks[7], (1, REL_HIDDENS[1]), jnp.float32) * 0.1,
        # mlp layer: 16 -> 16
        "mlp_w1": jax.random.normal(ks[8], (REL_HIDDENS[-1], MLP_HIDDENS[0]), jnp.float32) * 0.1,
        "mlp_b1": jax.random.normal(ks[9], (1, MLP_HIDDENS[0]), jnp.float32) * 0.1,
    }


# ----------------------------------- main -------------------------------------
if __name__ == "__main__":
    key = jax.random.PRNGKey(0)
    pkey, xkey1, xkey2 = jax.random.split(key, 3)
    params = init_params(pkey)

    # Small batch, single tile.
    B1 = 8
    x1 = jax.random.normal(xkey1, (B1, NUM_OBJECTS * OBJECT_SIZE), jnp.float32)
    out1 = jax.block_until_ready(relation_layer_forward(x1, params))
    ref1 = relation_layer_reference(x1, params)
    assert out1.shape == (B1, MLP_HIDDENS[-1])
    assert jnp.allclose(out1, ref1, atol=1e-5, rtol=1e-5)

    # Larger batch with a ragged remainder to exercise the batch grid
    # (small tile just for the test; production default is TILE_B_DEFAULT).
    B2 = 200
    x2 = jax.random.normal(xkey2, (B2, NUM_OBJECTS * OBJECT_SIZE), jnp.float32)
    out2 = jax.block_until_ready(relation_layer_forward(x2, params, tile_b=64))
    ref2 = relation_layer_reference(x2, params)
    assert out2.shape == (B2, MLP_HIDDENS[-1])
    assert jnp.allclose(out2, ref2, atol=1e-5, rtol=1e-5)

    print("KERNEL_OK")
</pallas_src>

<mosaic_0001>
module attributes {stable_mosaic.version = 11 : i64} {
  func.func @relation_kernel(%arg0: i32, %arg1: memref<8x15xf32, #tpu.memory_space<vmem>>, %arg2: memref<15x80xf32, #tpu.memory_space<vmem>>, %arg3: memref<1x80xf32, #tpu.memory_space<vmem>>, %arg4: memref<80x80xf32, #tpu.memory_space<vmem>>, %arg5: memref<1x80xf32, #tpu.memory_space<vmem>>, %arg6: memref<80x16xf32, #tpu.memory_space<vmem>>, %arg7: memref<1x16xf32, #tpu.memory_space<vmem>>, %arg8: memref<8x16xf32, #tpu.memory_space<vmem>>) attributes {dimension_semantics = [#tpu.dimension_semantics<parallel>], iteration_bounds = array<i64: 1>, scalar_prefetch = 0 : i64, scratch_operands = 0 : i64, tpu.core_type = #tpu.core_type<tc>, window_params = [{transform_indices = @transform_0, window_bounds = array<i64: 8, 15>}, {pipeline_mode = #tpu.pipeline_mode<synchronous>, transform_indices = @transform_1, window_bounds = array<i64: 15, 80>}, {pipeline_mode = #tpu.pipeline_mode<synchronous>, transform_indices = @transform_2, window_bounds = array<i64: 1, 80>}, {pipeline_mode = #tpu.pipeline_mode<synchronous>, transform_indices = @transform_3, window_bounds = array<i64: 80, 80>}, {pipeline_mode = #tpu.pipeline_mode<synchronous>, transform_indices = @transform_4, window_bounds = array<i64: 1, 80>}, {pipeline_mode = #tpu.pipeline_mode<synchronous>, transform_indices = @transform_5, window_bounds = array<i64: 80, 16>}, {pipeline_mode = #tpu.pipeline_mode<synchronous>, transform_indices = @transform_6, window_bounds = array<i64: 1, 16>}, {transform_indices = @transform_7, window_bounds = array<i64: 8, 16>}]} {
    %c0 = arith.constant 0 : index
    %c0_0 = arith.constant 0 : index
    %0 = vector.load %arg1[%c0, %c0_0] : memref<8x15xf32, #tpu.memory_space<vmem>>, vector<8x15xf32>
    %c0_1 = arith.constant 0 : index
    %c0_2 = arith.constant 0 : index
    %1 = vector.load %arg2[%c0_1, %c0_2] : memref<15x80xf32, #tpu.memory_space<vmem>>, vector<15x80xf32>
    %cst = arith.constant dense<0.000000e+00> : vector<8x80xf32>
    %2 = tpu.matmul %0, %1, %cst {dimension_numbers = #tpu.dot_dimension_numbers<[1], [0], [0], [1], [0, 0, 1, 1], [], []>} : vector<8x15xf32>, vector<15x80xf32>, vector<8x80xf32> -> vector<8x80xf32>
    %c0_3 = arith.constant 0 : index
    %c0_4 = arith.constant 0 : index
    %3 = vector.load %arg3[%c0_3, %c0_4] : memref<1x80xf32, #tpu.memory_space<vmem>>, vector<1x80xf32>
    %4 = vector.broadcast %3 : vector<1x80xf32> to vector<8x80xf32>
    %5 = arith.addf %2, %4 : vector<8x80xf32>
    %cst_5 = arith.constant 0.000000e+00 : f32
    %6 = vector.broadcast %cst_5 : f32 to vector<8x80xf32>
    %7 = arith.cmpf oge, %5, %6 : vector<8x80xf32>
    %cst_6 = arith.constant 0.00999999977 : f32
    %8 = vector.broadcast %cst_6 : f32 to vector<8x80xf32>
    %9 = arith.mulf %8, %5 : vector<8x80xf32>
    %10 = arith.select %7, %5, %9 : vector<8x80xi1>, vector<8x80xf32>
    %c0_7 = arith.constant 0 : index
    %c0_8 = arith.constant 0 : index
    %11 = vector.load %arg4[%c0_7, %c0_8] : memref<80x80xf32, #tpu.memory_space<vmem>>, vector<80x80xf32>
    %cst_9 = arith.constant dense<0.000000e+00> : vector<8x80xf32>
    %12 = tpu.matmul %10, %11, %cst_9 {dimension_numbers = #tpu.dot_dimension_numbers<[1], [0], [0], [1], [0, 0, 1, 1], [], []>} : vector<8x80xf32>, vector<80x80xf32>, vector<8x80xf32> -> vector<8x80xf32>
    %c0_10 = arith.constant 0 : index
    %c0_11 = arith.constant 0 : index
    %13 = vector.load %arg5[%c0_10, %c0_11] : memref<1x80xf32, #tpu.memory_space<vmem>>, vector<1x80xf32>
    %14 = vector.broadcast %13 : vector<1x80xf32> to vector<8x80xf32>
    %15 = arith.addf %12, %14 : vector<8x80xf32>
    %cst_12 = arith.constant 0.000000e+00 : f32
    %16 = vector.broadcast %cst_12 : f32 to vector<8x80xf32>
    %17 = arith.cmpf oge, %15, %16 : vector<8x80xf32>
    %cst_13 = arith.constant 0.00999999977 : f32
    %18 = vector.broadcast %cst_13 : f32 to vector<8x80xf32>
    %19 = arith.mulf %18, %15 : vector<8x80xf32>
    %20 = arith.select %17, %15, %19 : vector<8x80xi1>, vector<8x80xf32>
    %c0_14 = arith.constant 0 : index
    %c0_15 = arith.constant 0 : index
    %21 = vector.load %arg6[%c0_14, %c0_15] : memref<80x16xf32, #tpu.memory_space<vmem>>, vector<80x16xf32>
    %cst_16 = arith.constant dense<0.000000e+00> : vector<8x16xf32>
    %22 = tpu.matmul %20, %21, %cst_16 {dimension_numbers = #tpu.dot_dimension_numbers<[1], [0], [0], [1], [0, 0, 1, 1], [], []>} : vector<8x80xf32>, vector<80x16xf32>, vector<8x16xf32> -> vector<8x16xf32>
    %c0_17 = arith.constant 0 : index
    %c0_18 = arith.constant 0 : index
    %23 = vector.load %arg7[%c0_17, %c0_18] : memref<1x16xf32, #tpu.memory_space<vmem>>, vector<1x16xf32>
    %24 = vector.broadcast %23 : vector<1x16xf32> to vector<8x16xf32>
    %25 = arith.addf %22, %24 : vector<8x16xf32>
    %cst_19 = arith.constant 0.000000e+00 : f32
    %26 = vector.broadcast %cst_19 : f32 to vector<8x16xf32>
    %27 = arith.cmpf oge, %25, %26 : vector<8x16xf32>
    %cst_20 = arith.constant 0.00999999977 : f32
    %28 = vector.broadcast %cst_20 : f32 to vector<8x16xf32>
    %29 = arith.mulf %28, %25 : vector<8x16xf32>
    %30 = arith.select %27, %25, %29 : vector<8x16xi1>, vector<8x16xf32>
    %c0_21 = arith.constant 0 : index
    %c0_22 = arith.constant 0 : index
    %31 = vector.load %arg8[%c0_21, %c0_22] : memref<8x16xf32, #tpu.memory_space<vmem>>, vector<8x16xf32>
    tpu.vector_store %arg8[%c0_21, %c0_22], %30 {strides = array<i32>} : memref<8x16xf32, #tpu.memory_space<vmem>>, vector<8x16xf32>,
    return
  }
  func.func @transform_0(%arg0: i32) -> (i32, i32) {
    %c0_i32 = arith.constant 0 : i32
    %c0_i32_0 = arith.constant 0 : i32
    return %arg0, %c0_i32 : i32, i32
  }
  func.func @transform_1(%arg0: i32) -> (i32, i32) {
    %c0_i32 = arith.constant 0 : i32
    %c0_i32_0 = arith.constant 0 : i32
    %c0_i32_1 = arith.constant 0 : i32
    return %c0_i32, %c0_i32_0 : i32, i32
  }
  func.func @transform_2(%arg0: i32) -> (i32, i32) {
    %c0_i32 = arith.constant 0 : i32
    %c0_i32_0 = arith.constant 0 : i32
    %c0_i32_1 = arith.constant 0 : i32
    return %c0_i32, %c0_i32_0 : i32, i32
  }
  func.func @transform_3(%arg0: i32) -> (i32, i32) {
    %c0_i32 = arith.constant 0 : i32
    %c0_i32_0 = arith.constant 0 : i32
    %c0_i32_1 = arith.constant 0 : i32
    return %c0_i32, %c0_i32_0 : i32, i32
  }
  func.func @transform_4(%arg0: i32) -> (i32, i32) {
    %c0_i32 = arith.constant 0 : i32
    %c0_i32_0 = arith.constant 0 : i32
    %c0_i32_1 = arith.constant 0 : i32
    return %c0_i32, %c0_i32_0 : i32, i32
  }
  func.func @transform_5(%arg0: i32) -> (i32, i32) {
    %c0_i32 = arith.constant 0 : i32
    %c0_i32_0 = arith.constant 0 : i32
    %c0_i32_1 = arith.constant 0 : i32
    return %c0_i32, %c0_i32_0 : i32, i32
  }
  func.func @transform_6(%arg0: i32) -> (i32, i32) {
    %c0_i32 = arith.constant 0 : i32
    %c0_i32_0 = arith.constant 0 : i32
    %c0_i32_1 = arith.constant 0 : i32
    return %c0_i32, %c0_i32_0 : i32, i32
  }
  func.func @transform_7(%arg0: i32) -> (i32, i32) {
    %c0_i32 = arith.constant 0 : i32
    %c0_i32_0 = arith.constant 0 : i32
    return %arg0, %c0_i32 : i32, i32
  }
}

</mosaic_0001>

<bundles_post_ra>
// kernel: tpu_custom_call.1
= control target key start
LH: loop header
LB: loop body
LE: loop exit
PB: predicated region body
PF: predicated region fallthrough
CT: control target
= control target key end

     0   :  { %12 = vsyncpa [#allocation3], 0  ;;  %s622_s0 = inlined_call_operand.hbm [shape: f32[8,15], index: 0, kind: input, shape index: {}]   ;;  %s623_s1 = inlined_call_operand.vmem [shape: f32[15,80], index: 1, kind: input, shape index: {}]   ;;  %s624_s2 = inlined_call_operand.vmem [shape: f32[1,80], index: 2, kind: input, shape index: {}]   ;;  %s625_s3 = inlined_call_operand.vmem [shape: f32[80,80], index: 3, kind: input, shape index: {}]   ;;  %s626_s4 = inlined_call_operand.vmem [shape: f32[1,80], index: 4, kind: input, shape index: {}]   ;;  %s627_s5 = inlined_call_operand.vmem [shape: f32[80,16], index: 5, kind: input, shape index: {}]   ;;  %s628_s6 = inlined_call_operand.vmem [shape: f32[1,16], index: 6, kind: input, shape index: {}]   ;;  %s629_s7 = inlined_call_operand.hbm [shape: f32[8,16], index: 7, kind: output, shape index: {}]  }
   0x1   :  { %13 = vsyncpa [#allocation4], 0  ;;  %s467_s24 = smov [#allocation2]  }
   0x2   :  { %s20_s25 = sshll.u32 %s467_s24, 4  ;;  %s21_s25 = int_to_ptr.vmem [resolvable:$true] %s20_s25 }
   0x3   :  { %s431_s26 = scalar_lea.vmem %s21_s25, 128  ;;  %p436_p1 = scmp.lt.s32.totalorder %s21_s25, %s21_s25 }
   0x4   :  { %p432_p0 = scmp.ne.s32.totalorder %s21_s25, %s431_s26  ;;  %p437_p2 = scmp.lt.s32.totalorder %s431_s26, %s431_s26 }
   0x6   :  { %p438_p3 = por %p437_p2, %p436_p1 }
   0x8   :  { %p439_p4 = pnand %p438_p3, %p432_p0 }
   0xa   :  { %442 = shalt.err (!%p439_p4)
}
   0xb   :  { %23 = dma.hbm_to_vmem [thread:$0]  %s622_s0, 128, %s21_s25, [#allocation3]  }
   0xc   :  { %463 = dma.done.wait [#allocation3], 128  }
   0xd   :  { %464 = vsyncadd [#allocation3], 4294967168  ;;  %v468_v0 = vmov 0.0   ;;  %vm469_vm0 = vmmov 0   ;;  %vm53_vm1 = vcmask 1046528   ;;  %v40_v2 = vld [vmem:[%s623_s1] sm:$0xff] }
   0xe   :  { %366 = vmatprep.subr.mxu0 %v468_v0  ;;  %370 = vmatprep.mubr.msk.f32.mxu0 %vm469_vm0, %v468_v0  ;;  %v41_v1 = vld [vmem:[%s623_s1 + $0x8] sm:$0x7f]  ;;  %v39_v3 = vld [vmem:[#allocation2] sm:$0xff]  ;;  %vm49_vm2 = vcmask 121856   ;;  %v137_v6 = vld [vmem:[%s625_s3 + $0x38] sm:$0xff]  ;;  %vm147_vm4 = vcmask 654336  }
   0xf   :  { %373 = vmatprep.subr.mxu1 %v468_v0  ;;  %393 = vmatprep.mubr.msk.f32.mxu1 %vm469_vm0, %v468_v0  ;;  %v139_v4 = vld [vmem:[%s625_s3 + $0x48] sm:$0xff]  ;;  %v138_v5 = vld [vmem:[%s625_s3 + $0x40] sm:$0xff]  ;;  %v136_v7 = vld [vmem:[%s625_s3 + $0x30] sm:$0xff]  ;;  %vm317_vm7 = vcmask 130048  }
  0x10   :  { %367 = vmatpush3.msk.msra.mxu0 %vm53_vm1, %v41_v1  ;;  %374 = vmatpush3.msra.mxu1 %v139_v4  ;;  %v135_v8 = vld [vmem:[%s625_s3 + $0x28] sm:$0xff]  ;;  %v134_v9 = vld [vmem:[%s625_s3 + $0x20] sm:$0xff]  ;;  %v133_v10 = vld [vmem:[%s625_s3 + $0x18] sm:$0xff] }
  0x11   :  { %368 = vmatprep.subr.mxu0 %v468_v0  ;;  %375 = vmatprep.subr.mxu1 %v468_v0  ;;  %v132_v11 = vld [vmem:[%s625_s3 + $0x10] sm:$0xff]  ;;  %v131_v12 = vld [vmem:[%s625_s3 + $0x8] sm:$0xff]  ;;  %v130_v13 = vld [vmem:[%s625_s3] sm:$0xff] }
  0x12   :  { %369 = vmatpush3.msra.mxu0 %v40_v2  ;;  %376 = vmatpush3.msra.mxu1 %v138_v5  ;;  %v233_v14 = vld [vmem:[%s627_s5 + $0x48] sm:$0xff]  ;;  %v232_v15 = vld [vmem:[%s627_s5 + $0x40] sm:$0xff]  ;;  %v231_v16 = vld [vmem:[%s627_s5 + $0x38] sm:$0xff] }
  0x13   :  { %371 = vmatmul.mubr.msk.f32.vlgmr.msra.gmra.mxu0 %vm49_vm2, %v39_v3  ;;  %377 = vmatprep.subr.mxu1 %v468_v0  ;;  %v230_v17 = vld [vmem:[%s627_s5 + $0x30] sm:$0xff]  ;;  %v229_v18 = vld [vmem:[%s627_s5 + $0x28] sm:$0xff]  ;;  %v228_v19 = vld [vmem:[%s627_s5 + $0x20] sm:$0xff] }
  0x14   :  { %396 = vmatprep.subr.mxu0 %v468_v0  ;;  %378 = vmatpush3.msra.mxu1 %v137_v6  ;;  %v227_v20 = vld [vmem:[%s627_s5 + $0x18] sm:$0xff]  ;;  %v334_v21 = vld [vmem:[%s624_s2] ss:$0 sm:$0xff]  ;;  %v226_v27 = vld [vmem:[%s627_s5 + $0x10] sm:$0xff] }
  0x15   :  { %416 = vmatprep.mubr.msk.f32.mxu0 %vm469_vm0, %v468_v0  ;;  %379 = vmatprep.subr.mxu1 %v468_v0  ;;  %v225_v28 = vld [vmem:[%s627_s5 + $0x8] sm:$0xff]  ;;  %v224_v29 = vld [vmem:[%s627_s5] sm:$0xff]  ;;  %s470_s5 = smov [#allocation5]  }
  0x16   :  { %380 = vmatpush3.msra.mxu1 %v136_v7  ;;  %397 = vmatpush3.msra.mxu0 %v233_v14  ;;  %v337_v30 = vld [vmem:[%s626_s4] ss:$0 sm:$0xff]  ;;  %s325_s27 = sshll.u32 %s470_s5, 4  ;;  %s326_s27 = int_to_ptr.vmem [resolvable:$true] %s325_s27 }
  0x17   :  { %381 = vmatprep.subr.mxu1 %v468_v0  ;;  %398 = vmatprep.subr.mxu0 %v468_v0  ;;  %v339_v36 = vld [vmem:[%s628_s6] ss:$0 sm:$0xff]  ;;  %s443_s4 = scalar_lea.vmem %s326_s27, 128  ;;  %p448_p6 = scmp.lt.s32.totalorder %s326_s27, %s326_s27 }
  0x18   :  { %382 = vmatpush3.msra.mxu1 %v135_v8  ;;  %399 = vmatpush3.msra.mxu0 %v232_v15  ;;  %p444_p5 = scmp.ne.s32.totalorder %s326_s27, %s443_s4  ;;  %p449_p7 = scmp.lt.s32.totalorder %s443_s4, %s443_s4 }
  0x19   :  { %383 = vmatprep.subr.mxu1 %v468_v0  ;;  %400 = vmatprep.subr.mxu0 %v468_v0 }
  0x1a   :  { %384 = vmatpush3.msra.mxu1 %v134_v9  ;;  %401 = vmatpush3.msra.mxu0 %v231_v16  ;;  %p450_p8 = por %p449_p7, %p448_p6 }
  0x1b   :  { %385 = vmatprep.subr.mxu1 %v468_v0  ;;  %402 = vmatprep.subr.mxu0 %v468_v0 }
  0x1c   :  { %386 = vmatpush3.msra.mxu1 %v133_v10  ;;  %403 = vmatpush3.msra.mxu0 %v230_v17  ;;  %p451_p9 = pnand %p450_p8, %p444_p5 }
  0x1d   :  { %387 = vmatprep.subr.mxu1 %v468_v0  ;;  %404 = vmatprep.subr.mxu0 %v468_v0 }
  0x1e   :  { %388 = vmatpush3.msra.mxu1 %v132_v11  ;;  %405 = vmatpush3.msra.mxu0 %v229_v18 }
  0x1f   :  { %389 = vmatprep.subr.mxu1 %v468_v0  ;;  %406 = vmatprep.subr.mxu0 %v468_v0 }
  0x20   :  { %390 = vmatpush3.msra.mxu1 %v131_v12  ;;  %407 = vmatpush3.msra.mxu0 %v228_v19 }
  0x21   :  { %391 = vmatprep.subr.mxu1 %v468_v0  ;;  %408 = vmatprep.subr.mxu0 %v468_v0 }
  0x22   :  { %392 = vmatpush3.msra.mxu1 %v130_v13  ;;  %409 = vmatpush3.msra.mxu0 %v227_v20 }
  0x23   :  { %410 = vmatprep.subr.mxu0 %v468_v0 }
  0x24   :  { %411 = vmatpush3.msra.mxu0 %v226_v27 }
  0x25   :  { %412 = vmatprep.subr.mxu0 %v468_v0 }
  0x26   :  { %413 = vmatpush3.msra.mxu0 %v225_v28 }
  0x27   :  { %414 = vmatprep.subr.mxu0 %v468_v0 }
  0x28   :  { %415 = vmatpush3.msra.mxu0 %v224_v29 }
  0xd3   :  { %v123_v22 = vpop.f32.mrf.mxu0 }
  0xd4   :  { %v124_v23 = vadd.f32 %v334_v21, %v123_v22 }
  0xd5   :  { %v372_v24 = vpop.f32.mrf.mxu0 }
  0xd6   :  { %vm127_vm3 = vcmp.ge.f32.partialorder %v124_v23, 0.0  ;;  %v128_v25 = vmul.f32 0.01, %v124_v23 }
  0xd8   :  { %v129_v26 = vsel %vm127_vm3, %v124_v23, %v128_v25 }
  0xd9   :  { %394 = vmatmul.mubr.msk.f32.vlgmr.msra.gmra.mxu1 %vm147_vm4, %v129_v26 }
 0x199   :  { %v217_v31 = vpop.f32.mrf.mxu1 }
 0x19a   :  { %v218_v32 = vadd.f32 %v337_v30, %v217_v31 }
 0x19b   :  { %v395_v33 = vpop.f32.mrf.mxu1 }
 0x19c   :  { %vm221_vm5 = vcmp.ge.f32.partialorder %v218_v32, 0.0  ;;  %v222_v34 = vmul.f32 0.01, %v218_v32 }
 0x19e   :  { %v223_v35 = vsel %vm221_vm5, %v218_v32, %v222_v34 }
 0x19f   :  { %417 = vmatmul.mubr.msk.f32.vlgmr.msra.gmra.mxu0 %vm147_vm4, %v223_v35 }
 0x25f   :  { %v310_v37 = vpop.f32.mrf.mxu0 }
 0x260   :  { %v311_v38 = vadd.f32 %v339_v36, %v310_v37 }
 0x261   :  { %v418_v39 = vpop.f32.mrf.mxu0 }
 0x262   :  { %vm314_vm6 = vcmp.ge.f32.partialorder %v311_v38, 0.0  ;;  %v315_v40 = vmul.f32 0.01, %v311_v38 }
 0x264   :  { %v316_v41 = vsel %vm314_vm6, %v311_v38, %v315_v40 }
 0x265   :  { %318 = vst.msk [vmem:[#allocation5] sm:$0xff] %vm317_vm7, %v316_v41 }
 0x266   :  { %454 = shalt.err (!%p451_p9)
}
 0x267   :  { %328 = dma.vmem_to_hbm [thread:$0]  %s326_s27, 128, %s629_s7, [#allocation4]  }
 0x268   :  { %465 = dma.done.wait [#allocation4], 128  }
 0x269   :  { %466 = vsyncadd [#allocation4], 4294967168 }
 0x26a   :  { %332 = vsyncpa [#allocation3], 1 }
 0x26b   :  { %333 = vsyncpa [#allocation4], 1 }

</bundles_post_ra>
